<compile_context>
chip_gen: v7x
topology: tpu7x:2x2x1
jax: 0.10.0
libtpu: 0.0.40
codegen_flags: <defaults>
</compile_context>

<pallas_src>
import functools

import jax
import jax.numpy as jnp
from jax.experimental import pallas as pl
from jax.experimental.pallas import tpu as pltpu

EPS = 1e-5
_SUBLANE = 8
_LANE = 128
_MAX_IN_BLOCK_BYTES = 4 * 1024 * 1024  # input tile budget (output tile is 2x)


def _round_up(x, m):
    return (x + m - 1) // m * m


def _srm_concat_kernel(x_ref, p_ref, o_ref, *, hw):
    # x_ref: (Rb, HW) f32   rows = flattened (n, c), lanes = spatial
    # p_ref: (Rb, 3)  f32   per-row folded params [gamma*w_mean, gamma*w_std, beta]
    # o_ref: (2, Rb, HW)    slab 0 = recalibrated, slab 1 = passthrough copy
    x = x_ref[...]

    mean = jnp.sum(x, axis=-1, keepdims=True) * (1.0 / hw)
    d = x - mean                                        # two-pass (no cancellation)
    var_u = jnp.sum(d * d, axis=-1, keepdims=True) * (1.0 / (hw - 1.0))
    std = jnp.sqrt(var_u + EPS)

    p = p_ref[...]
    gate = jax.nn.sigmoid(p[:, 0:1] * mean + p[:, 1:2] * std + p[:, 2:3])  # (Rb, 1)

    o_ref[0, :, :] = x * gate
    o_ref[1, :, :] = x


def srmcon_forward(x_nchw, w_mean, w_std, gamma, beta):
    """y = concat(SRM(x), x) along batch. x: (N, C, H, W) float32."""
    n, c, h, w = x_nchw.shape
    hw = h * w
    assert hw >= 2, "unbiased variance requires H*W >= 2"
    r = n * c

    # Lane-dense layout: one row per (n, c), spatial along lanes (free view).
    x_rows = x_nchw.reshape(r, hw)

    # Row block: multiple of 8 sublanes, sized against the VMEM budget, capped
    # so the grid has >= ~4 blocks (keeps both v7x TensorCores busy).
    rb_budget = max(_SUBLANE,
                    (_MAX_IN_BLOCK_BYTES // (hw * 4)) // _SUBLANE * _SUBLANE)
    rb_multicore = max(_SUBLANE, _round_up(-(-r // 4), _SUBLANE))
    rb = min(rb_budget, rb_multicore, _round_up(r, _SUBLANE))
    grid = -(-r // rb)

    # Pre-fold BN affine into CFC weights: gate = sigmoid(a*mean + b*std + beta).
    a = gamma * w_mean
    b = gamma * w_std
    params = jnp.tile(jnp.stack([a, b, beta], axis=-1), (n, 1))  # (N*C, 3)

    # Explicit VMEM limit from the double-buffered working set.
    hw_pad = _round_up(hw, _LANE)
    in_bytes = rb * hw_pad * 4
    out_bytes = 2 * in_bytes
    p_bytes = rb * _LANE * 4
    vmem_need = 2 * (in_bytes + out_bytes + p_bytes) + (2 << 20)
    vmem_limit = int(min(max(vmem_need, 32 << 20), 64 << 20))
    # TODO(synk): for very large H*W (single 8-row block > ~10 MiB) add an
    # HW-chunked two-phase variant (accumulate sum/sumsq, then apply gate).

    kernel = functools.partial(_srm_concat_kernel, hw=float(hw))
    out = pl.pallas_call(
        kernel,
        out_shape=jax.ShapeDtypeStruct((2, r, hw), x_rows.dtype),
        grid_spec=pltpu.PrefetchScalarGridSpec(
            num_scalar_prefetch=0,
            grid=(grid,),
            in_specs=[
                pl.BlockSpec((rb, hw), lambda i: (i, 0)),
                pl.BlockSpec((rb, 3), lambda i: (i, 0)),
            ],
            out_specs=pl.BlockSpec((2, rb, hw), lambda i: (0, i, 0)),
        ),
        compiler_params=pltpu.CompilerParams(
            dimension_semantics=("parallel",),
            vmem_limit_bytes=vmem_limit),
        cost_estimate=pl.CostEstimate(
            flops=6 * r * hw,
            transcendentals=r,
            bytes_accessed=3 * r * hw * 4 + r * 3 * 4),
    )(x_rows, params)

    # (2, N*C, HW) -> (2N, C, H, W) is a contiguous (free) reshape:
    # batches [0..N-1] = SRM(x), [N..2N-1] = x, matching torch.cat((SRM(x), x)).
    return out.reshape(2 * n, c, h, w)


def _reference(x, w_mean, w_std, gamma, beta):
    n, c, h, w = x.shape
    xf = x.reshape(n, c, -1)
    mean = xf.mean(axis=-1)
    var = xf.var(axis=-1, ddof=1)
    std = jnp.sqrt(var + EPS)
    z = w_mean[None, :] * mean + w_std[None, :] * std
    z = gamma[None, :] * z + beta[None, :]
    g = jax.nn.sigmoid(z)[:, :, None, None]
    return jnp.concatenate([x * g, x], axis=0)


if __name__ == "__main__":
    key = jax.random.PRNGKey(0)
    k_x, k_wm, k_ws, k_x2 = jax.random.split(key, 4)

    # Primary (aligned) case: N=2, C=4, H=W=16.
    N, C, H, W = 2, 4, 16, 16
    x = jax.random.normal(k_x, (N, C, H, W), dtype=jnp.float32)
    w_mean = jax.random.normal(k_wm, (C,), dtype=jnp.float32) * 0.1
    w_std = jax.random.normal(k_ws, (C,), dtype=jnp.float32) * 0.1
    gamma = jnp.ones((C,), dtype=jnp.float32)
    beta = jnp.zeros((C,), dtype=jnp.float32)

    out = jax.block_until_ready(srmcon_forward(x, w_mean, w_std, gamma, beta))
    ref = _reference(x, w_mean, w_std, gamma, beta)
    assert out.shape == (2 * N, C, H, W), out.shape
    assert jnp.allclose(out, ref, atol=1e-5, rtol=1e-5), "mismatch (aligned case)"

    # Unaligned case: r = 15 rows (not %8), HW = 49 (not %128) — exercises the
    # no-padding path with a masked partial edge row-block.
    N2, C2, H2, W2 = 3, 5, 7, 7
    x2 = jax.random.normal(k_x2, (N2, C2, H2, W2), dtype=jnp.float32)
    w_mean2 = jax.random.normal(k_wm, (C2,), dtype=jnp.float32) * 0.1
    w_std2 = jax.random.normal(k_ws, (C2,), dtype=jnp.float32) * 0.1
    gamma2 = jnp.full((C2,), 1.2, dtype=jnp.float32)
    beta2 = jnp.full((C2,), -0.1, dtype=jnp.float32)

    out2 = jax.block_until_ready(
        srmcon_forward(x2, w_mean2, w_std2, gamma2, beta2))
    ref2 = _reference(x2, w_mean2, w_std2, gamma2, beta2)
    assert out2.shape == (2 * N2, C2, H2, W2), out2.shape
    assert jnp.allclose(out2, ref2, atol=1e-5, rtol=1e-5), "mismatch (unaligned case)"

    print("KERNEL_OK")
</pallas_src>

<mosaic_0001>
module attributes {stable_mosaic.version = 11 : i64} {
  func.func @_srm_concat_kernel(%arg0: i32, %arg1: memref<8x256xf32, #tpu.memory_space<vmem>>, %arg2: memref<8x3xf32, #tpu.memory_space<vmem>>, %arg3: memref<2x8x256xf32, #tpu.memory_space<vmem>>) attributes {dimension_semantics = [#tpu.dimension_semantics<parallel>], iteration_bounds = array<i64: 1>, scalar_prefetch = 0 : i64, scratch_operands = 0 : i64, tpu.core_type = #tpu.core_type<tc>, window_params = [{transform_indices = @transform_0, window_bounds = array<i64: 8, 256>}, {transform_indices = @transform_1, window_bounds = array<i64: 8, 3>}, {transform_indices = @transform_2, window_bounds = array<i64: 2, 8, 256>}]} {
    %c0 = arith.constant 0 : index
    %c0_0 = arith.constant 0 : index
    %0 = vector.load %arg1[%c0, %c0_0] : memref<8x256xf32, #tpu.memory_space<vmem>>, vector<8x256xf32>
    %cst = arith.constant dense<0.000000e+00> : vector<8xf32>
    %1 = vector.multi_reduction <add>, %0, %cst [1] : vector<8x256xf32> to vector<8xf32>
    %2 = vector.shape_cast %1 : vector<8xf32> to vector<8x1xf32>
    %cst_1 = arith.constant 3.906250e-03 : f32
    %3 = vector.broadcast %cst_1 : f32 to vector<8x1xf32>
    %4 = arith.mulf %2, %3 : vector<8x1xf32>
    %5 = vector.broadcast %4 : vector<8x1xf32> to vector<8x256xf32>
    %6 = arith.subf %0, %5 : vector<8x256xf32>
    %7 = arith.mulf %6, %6 : vector<8x256xf32>
    %cst_2 = arith.constant dense<0.000000e+00> : vector<8xf32>
    %8 = vector.multi_reduction <add>, %7, %cst_2 [1] : vector<8x256xf32> to vector<8xf32>
    %9 = vector.shape_cast %8 : vector<8xf32> to vector<8x1xf32>
    %cst_3 = arith.constant 0.00392156886 : f32
    %10 = vector.broadcast %cst_3 : f32 to vector<8x1xf32>
    %11 = arith.mulf %9, %10 : vector<8x1xf32>
    %cst_4 = arith.constant 9.99999974E-6 : f32
    %12 = vector.broadcast %cst_4 : f32 to vector<8x1xf32>
    %13 = arith.addf %11, %12 : vector<8x1xf32>
    %14 = math.sqrt %13 : vector<8x1xf32>
    %c0_5 = arith.constant 0 : index
    %c0_6 = arith.constant 0 : index
    %15 = vector.load %arg2[%c0_5, %c0_6] : memref<8x3xf32, #tpu.memory_space<vmem>>, vector<8x3xf32>
    %16 = vector.extract_strided_slice %15 {offsets = [0, 0], sizes = [8, 1], strides = [1, 1]} : vector<8x3xf32> to vector<8x1xf32>
    %17 = arith.mulf %16, %4 : vector<8x1xf32>
    %18 = vector.extract_strided_slice %15 {offsets = [0, 1], sizes = [8, 1], strides = [1, 1]} : vector<8x3xf32> to vector<8x1xf32>
    %19 = arith.mulf %18, %14 : vector<8x1xf32>
    %20 = arith.addf %17, %19 : vector<8x1xf32>
    %21 = vector.extract_strided_slice %15 {offsets = [0, 2], sizes = [8, 1], strides = [1, 1]} : vector<8x3xf32> to vector<8x1xf32>
    %22 = arith.addf %20, %21 : vector<8x1xf32>
    %23 = arith.negf %22 : vector<8x1xf32>
    %24 = math.exp %23 : vector<8x1xf32>
    %cst_7 = arith.constant 1.000000e+00 : f32
    %25 = vector.broadcast %cst_7 : f32 to vector<8x1xf32>
    %26 = arith.addf %25, %24 : vector<8x1xf32>
    %27 = arith.divf %25, %26 : vector<8x1xf32>
    %28 = vector.broadcast %27 : vector<8x1xf32> to vector<8x256xf32>
    %29 = arith.mulf %0, %28 : vector<8x256xf32>
    %c0_8 = arith.constant 0 : index
    %c0_9 = arith.constant 0 : index
    %c0_10 = arith.constant 0 : index
    %30 = vector.load %arg3[%c0_8, %c0_9, %c0_10] : memref<2x8x256xf32, #tpu.memory_space<vmem>>, vector<1x8x256xf32>
    %31 = vector.shape_cast %30 : vector<1x8x256xf32> to vector<8x256xf32>
    %32 = vector.shape_cast %29 : vector<8x256xf32> to vector<1x8x256xf32>
    tpu.vector_store %arg3[%c0_8, %c0_9, %c0_10], %32 {strides = array<i32>} : memref<2x8x256xf32, #tpu.memory_space<vmem>>, vector<1x8x256xf32>,
    %c1 = arith.constant 1 : index
    %c0_11 = arith.constant 0 : index
    %c0_12 = arith.constant 0 : index
    %33 = vector.load %arg3[%c1, %c0_11, %c0_12] : memref<2x8x256xf32, #tpu.memory_space<vmem>>, vector<1x8x256xf32>
    %34 = vector.shape_cast %33 : vector<1x8x256xf32> to vector<8x256xf32>
    %35 = vector.shape_cast %0 : vector<8x256xf32> to vector<1x8x256xf32>
    tpu.vector_store %arg3[%c1, %c0_11, %c0_12], %35 {strides = array<i32>} : memref<2x8x256xf32, #tpu.memory_space<vmem>>, vector<1x8x256xf32>,
    return
  }
  func.func @transform_0(%arg0: i32) -> (i32, i32) {
    %c0_i32 = arith.constant 0 : i32
    %c0_i32_0 = arith.constant 0 : i32
    return %arg0, %c0_i32 : i32, i32
  }
  func.func @transform_1(%arg0: i32) -> (i32, i32) {
    %c0_i32 = arith.constant 0 : i32
    %c0_i32_0 = arith.constant 0 : i32
    return %arg0, %c0_i32 : i32, i32
  }
  func.func @transform_2(%arg0: i32) -> (i32, i32, i32) {
    %c0_i32 = arith.constant 0 : i32
    %c0_i32_0 = arith.constant 0 : i32
    %c0_i32_1 = arith.constant 0 : i32
    return %c0_i32, %arg0, %c0_i32_0 : i32, i32, i32
  }
}

</mosaic_0001>

<bundles_post_ra>
// kernel: tpu_custom_call.1
= control target key start
LH: loop header
LB: loop body
LE: loop exit
PB: predicated region body
PF: predicated region fallthrough
CT: control target
= control target key end

     0   :  { %7 = vsyncpa [#allocation3], 0  ;;  %s206_s0 = inlined_call_operand.hbm [shape: f32[8,256], index: 0, kind: input, shape index: {}]   ;;  %s207_s1 = inlined_call_operand.vmem [shape: f32[8,3], index: 1, kind: input, shape index: {}]   ;;  %s208_s2 = inlined_call_operand.hbm [shape: f32[2,8,256], index: 2, kind: output, shape index: {}]  }
   0x1   :  { %8 = vsyncpa [#allocation4], 0  ;;  %s157_s9 = smov [#allocation2]   ;;  %s109_s13 = scalar_lea.hbm %s206_s0, 256 }
   0x2   :  { %s15_s10 = sshll.u32 %s157_s9, 4  ;;  %p110_p0 = scmp.ne.s32.totalorder %s206_s0, %s109_s13  ;;  %s16_s10 = int_to_ptr.vmem [resolvable:$true] %s15_s10 }
   0x3   :  { %p113_p1 = scmp.lt.u32.totalorder %s109_s13, %s206_s0 }
   0x5   :  { %p115_p2 = pnand %p113_p1, %p110_p0 }
   0x7   :  { %118 = shalt.err (!%p115_p2)
}
   0x8   :  { %s119_s18 = scalar_lea.vmem %s16_s10, 256  ;;  %p124_p4 = scmp.lt.s32.totalorder %s16_s10, %s16_s10 }
   0x9   :  { %p120_p3 = scmp.ne.s32.totalorder %s16_s10, %s119_s18  ;;  %p125_p5 = scmp.lt.s32.totalorder %s119_s18, %s119_s18 }
   0xb   :  { %p126_p6 = por %p125_p5, %p124_p4 }
   0xd   :  { %p127_p7 = pnand %p126_p6, %p120_p3 }
   0xf   :  { %130 = shalt.err (!%p127_p7)
}
  0x10   :  { %18 = dma.hbm_to_vmem [thread:$0]  %s206_s0, 256, %s16_s10, [#allocation3]  }
  0x11   :  { %153 = dma.done.wait [#allocation3], 256  }
  0x12   :  { %154 = vsyncadd [#allocation3], 4294967040  ;;  %v24_v0 = vld [vmem:[#allocation2] sm:$0xff]  ;;  %v25_v1 = vld [vmem:[#allocation2 + $0x8] sm:$0xff]  ;;  %s158_s22 = smov 127   ;;  %s159_s23 = smov 126  }
  0x13   :  { %v26_v2 = vadd.f32 %v25_v1, %v24_v0  ;;  %75 = vst [vmem:[#allocation5 + $0x10] sm:$0xff] %v24_v0  ;;  %76 = vst [vmem:[#allocation5 + $0x18] sm:$0xff] %v25_v1  ;;  %v46_v18 = vld [vmem:[%s207_s1] sm:$0xff]  ;;  %v160_v20 = vmov 0   ;;  %s161_s1 = smov [#allocation5]  }
  0x14   :  { %102 = vset.pattern.permute.xlu0 %v160_v20  ;;  %s82_s24 = sshll.u32 %s161_s1, 4  ;;  %s83_s24 = int_to_ptr.vmem [resolvable:$true] %s82_s24 }
  0x15   :  { %27 = vadd.xlane.f32.xlu0 %v26_v2  ;;  %s131_s25 = scalar_lea.vmem %s83_s24, 512  ;;  %p136_p9 = scmp.lt.s32.totalorder %s83_s24, %s83_s24 }
  0x16   :  { %p132_p8 = scmp.ne.s32.totalorder %s83_s24, %s131_s25  ;;  %p137_p10 = scmp.lt.s32.totalorder %s131_s25, %s131_s25 }
  0x18   :  { %p138_p11 = por %p137_p10, %p136_p9 }
  0x1a   :  { %p139_p12 = pnand %p138_p11, %p132_p8 }
  0xa2   :  { %v28_v3 = vpop.xlane.xlu0 %27 }
  0xa3   :  { %v29_v4 = vmul.f32 0.00390625, %v28_v3 }
  0xa5   :  { %v30_v5 = vsub.f32 %v24_v0, %v29_v4  ;;  %v31_v6 = vsub.f32 %v25_v1, %v29_v4  ;;  %v47_v22 = vmul.f32 %v46_v18, %v29_v4 }
  0xa7   :  { %v32_v7 = vmul.f32 %v30_v5, %v30_v5  ;;  %v33_v8 = vmul.f32 %v31_v6, %v31_v6 }
  0xa9   :  { %v34_v9 = vadd.f32 %v33_v8, %v32_v7 }
  0xab   :  { %35 = vadd.xlane.f32.xlu0 %v34_v9 }
 0x138   :  { %v36_v10 = vpop.xlane.xlu0 %35 }
 0x139   :  { %v37_v11 = vmul.f32 0.003921569, %v36_v10 }
 0x13b   :  { %v38_v12 = vadd.f32 1e-05, %v37_v11 }
 0x13d   :  { %103 = vrsqrt.f32 %v38_v12  ;;  %vm41_vm0 = vcmp.eq.f32.partialorder %v38_v12, inf  ;;  %v44_v15 = vand.u32 2147483648, %v38_v12  ;;  %vm43_vm1 = vcmp.eq.f32.partialorder %v38_v12, 0.0 }
 0x147   :  { %v104_v13 = vpop.eup %103 }
 0x148   :  { %v40_v14 = vmul.f32 %v104_v13, %v38_v12 }
 0x14a   :  { %v42_v16 = vsel %vm41_vm0, %v38_v12, %v40_v14 }
 0x14b   :  { %v45_v17 = vsel %vm43_vm1, %v44_v15, %v42_v16 }
 0x14c   :  { %v48_v19 = vmul.f32 %v46_v18, %v45_v17 }
 0x14e   :  { %50 = vrot.lane.b32.xlu1 %v48_v19, %s158_s22 }
 0x152   :  { %55 = vrot.lane.b32.xlu1 %v46_v18, %s159_s23 }
 0x1c0   :  { %v51_v21 = vpop.permute.xlu1 %50 }
 0x1c1   :  { %v53_v23 = vadd.f32 %v51_v21, %v47_v22 }
 0x1c4   :  { %v56_v24 = vpop.permute.xlu1 %55 }
 0x1c5   :  { %v58_v25 = vadd.f32 %v56_v24, %v53_v23 }
 0x1c7   :  { %v94_v26 = vmul.f32 -1.442695, %v58_v25 }
 0x1c9   :  { %105 = vpow2.f32 %v94_v26 }
 0x1d3   :  { %v106_v27 = vpop.eup %105 }
 0x1d4   :  { %v62_v28 = vadd.f32 1.0, %v106_v27 }
 0x1d6   :  { %107 = vrcp.f32 %v62_v28 }
 0x1e0   :  { %v108_v29 = vpop.eup %107 }
 0x1e1   :  { %67 = vperm.xlu0 %102, %v108_v29  }
 0x260   :  { %v68_v30 = vpop.permute.xlu0 %67 }
 0x261   :  { %v70_v31 = vmul.f32 %v68_v30, %v24_v0  ;;  %v71_v32 = vmul.f32 %v68_v30, %v25_v1 }
 0x263   :  { %72 = vst [vmem:[#allocation5] sm:$0xff] %v70_v31  ;;  %73 = vst [vmem:[#allocation5 + $0x8] sm:$0xff] %v71_v32 }
 0x264   :  { %142 = shalt.err (!%p139_p12)
}
 0x265   :  { %s143_s28 = scalar_lea.hbm %s208_s2, 512 }
 0x266   :  { %p144_p13 = scmp.ne.s32.totalorder %s208_s2, %s143_s28  ;;  %p147_p0 = scmp.lt.u32.totalorder %s143_s28, %s208_s2 }
 0x268   :  { %p149_p1 = pnand %p147_p0, %p144_p13 }
 0x26a   :  { %152 = shalt.err (!%p149_p1)
}
 0x26b   :  { %s162_s5 = smov 256   ;;  %s163_s6 = smov 16  }
 0x26c   :  { %88 = dma.vmem_to_hbm [thread:$0]  %s83_s24, 512, %s208_s2, [#allocation4], %s162_s5, %s162_s5, %s163_s6  }
 0x26d   :  { %155 = dma.done.wait [#allocation4], 512  }
 0x26e   :  { %156 = vsyncadd [#allocation4], 4294966784 }
 0x26f   :  { %92 = vsyncpa [#allocation3], 1 }
 0x270   :  { %93 = vsyncpa [#allocation4], 1 }

</bundles_post_ra>
